<compile_context>
chip_gen: v7x
topology: tpu7x:2x2x1
jax: 0.10.0
libtpu: 0.0.40
codegen_flags: <defaults>
</compile_context>

<pallas_src>
import jax
import jax.numpy as jnp
from jax.experimental import pallas as pl
from jax.experimental.pallas import tpu as pltpu


def _round_up(x, m):
    return ((x + m - 1) // m) * m


# ----------------------------------------------------------------------------
# Pallas kernel: fused one-hot + 2-layer MLP
# ----------------------------------------------------------------------------
def _atom_mlp_kernel(idx_ref, xs_ref, w1c_ref, w1s_ref, b1_ref, w2_ref, b2_ref, o_ref):
    # idx_ref : (TE, 1)        int32   categorical atom type per row
    # xs_ref  : (TE, NS_PAD)   bf16    [scalar_feats ++ t_embed ++ zero-pad]
    # w1c_ref : (NC_PAD, HID_PAD) bf16 rows of W1 for the categorical one-hot block
    # w1s_ref : (NS_PAD, HID_PAD) bf16 rows of W1 for the scalar block
    # b1_ref  : (1, HID_PAD)   f32
    # w2_ref  : (HID_PAD, OUT_PAD) bf16
    # b2_ref  : (1, OUT_PAD)   f32
    # o_ref   : (TE, OUT_PAD)  f32    (lane-dense, 128-multiple)
    te = idx_ref.shape[0]
    nc = w1c_ref.shape[0]

    # one_hot(idx) computed in-register: (TE, NC_PAD) bf16
    iota = jax.lax.broadcasted_iota(jnp.int32, (te, nc), 1)
    onehot = (iota == idx_ref[...]).astype(jnp.bfloat16)

    # Layer 1: one_hot @ W1_cat + xs @ W1_scalar + b1, f32 accumulation on MXU.
    h = jnp.dot(onehot, w1c_ref[...], preferred_element_type=jnp.float32)
    h = h + jnp.dot(xs_ref[...], w1s_ref[...], preferred_element_type=jnp.float32)
    h = jnp.maximum(h + b1_ref[...], 0.0)                       # ReLU

    # Layer 2.
    y = jnp.dot(h.astype(jnp.bfloat16), w2_ref[...], preferred_element_type=jnp.float32)
    o_ref[...] = (y + b2_ref[...]).astype(o_ref.dtype)


def atom_mlp_pallas(idx, xs, w1c, w1s, b1, w2, b2, *, row_tile):
    """Fused encoder MLP over rows. All shapes already padded/lane-dense."""
    E, NS = xs.shape
    NC, HID = w1c.shape
    OUT = w2.shape[1]
    assert E % row_tile == 0  # wrapper guarantees this via row padding

    grid = (E // row_tile,)

    flops = 2 * E * (NC * HID + NS * HID + HID * OUT)
    bytes_accessed = (
        idx.size * 4 + xs.size * 2                     # row-tiled inputs
        + w1c.size * 2 + w1s.size * 2 + w2.size * 2    # resident bf16 weights
        + b1.size * 4 + b2.size * 4                    # resident f32 biases
        + E * OUT * 4                                  # f32 output
    )
    cost = pl.CostEstimate(flops=flops, transcendentals=0,
                           bytes_accessed=bytes_accessed)

    return pl.pallas_call(
        _atom_mlp_kernel,
        out_shape=jax.ShapeDtypeStruct((E, OUT), jnp.float32),
        grid_spec=pltpu.PrefetchScalarGridSpec(
            num_scalar_prefetch=0,
            grid=grid,
            in_specs=[
                pl.BlockSpec((row_tile, 1), lambda i: (i, 0)),    # idx (tiled rows)
                pl.BlockSpec((row_tile, NS), lambda i: (i, 0)),   # xs  (tiled rows)
                pl.BlockSpec((NC, HID), lambda i: (0, 0)),        # W1_cat  (resident)
                pl.BlockSpec((NS, HID), lambda i: (0, 0)),        # W1_scal (resident)
                pl.BlockSpec((1, HID), lambda i: (0, 0)),         # b1
                pl.BlockSpec((HID, OUT), lambda i: (0, 0)),       # W2
                pl.BlockSpec((1, OUT), lambda i: (0, 0)),         # b2
            ],
            out_specs=pl.BlockSpec((row_tile, OUT), lambda i: (i, 0)),
        ),
        compiler_params=pltpu.CompilerParams(
            dimension_semantics=("parallel",),   # shards rows across TCs on v7x
        ),
        cost_estimate=cost,
    )(idx, xs, w1c, w1s, b1, w2, b2)


# ----------------------------------------------------------------------------
# AtomEncoder wrapper
# ----------------------------------------------------------------------------
class AtomEncoder:
    def __init__(self, emb_dim, feature_dims, sigma_embed_dim, key):
        self.num_categorical_features = feature_dims[0]
        self.num_scalar_features = feature_dims[1] + sigma_embed_dim
        infeat_dim = self.num_categorical_features + self.num_scalar_features
        hid = 2 * emb_dim
        self.emb_dim = emb_dim
        self.hid = hid

        k1, k2, k3, k4 = jax.random.split(key, 4)
        # Deterministic synthetic init (nn.Linear-like uniform scale), kept in f32.
        s1 = 1.0 / jnp.sqrt(infeat_dim)
        s2 = 1.0 / jnp.sqrt(hid)
        self.w1 = jax.random.uniform(k1, (infeat_dim, hid), jnp.float32, -s1, s1)
        self.b1 = jax.random.uniform(k2, (1, hid), jnp.float32, -s1, s1)
        self.w2 = jax.random.uniform(k3, (hid, emb_dim), jnp.float32, -s2, s2)
        self.b2 = jax.random.uniform(k4, (1, emb_dim), jnp.float32, -s2, s2)

        # ---- Padded, lane-dense, bf16 parameters used by the Pallas kernel ----
        NC, NS = self.num_categorical_features, self.num_scalar_features
        self.nc_pad = _round_up(NC, 16)        # bf16 sublane packing of W1 rows
        self.ns_pad = _round_up(NS, 16)
        self.hid_pad = _round_up(hid, 128)     # lane-dense hidden dim
        self.out_pad = _round_up(emb_dim, 128)  # lane-dense output -> unmasked stores

        w1c = jnp.zeros((self.nc_pad, self.hid_pad), jnp.float32)
        w1c = w1c.at[:NC, :hid].set(self.w1[:NC])
        w1s = jnp.zeros((self.ns_pad, self.hid_pad), jnp.float32)
        w1s = w1s.at[:NS, :hid].set(self.w1[NC:])
        b1p = jnp.zeros((1, self.hid_pad), jnp.float32).at[:, :hid].set(self.b1)
        w2p = jnp.zeros((self.hid_pad, self.out_pad), jnp.float32)
        w2p = w2p.at[:hid, :emb_dim].set(self.w2)
        b2p = jnp.zeros((1, self.out_pad), jnp.float32).at[:, :emb_dim].set(self.b2)

        self.w1c_bf = w1c.astype(jnp.bfloat16)
        self.w1s_bf = w1s.astype(jnp.bfloat16)
        self.b1_pad = b1p
        self.w2_bf = w2p.astype(jnp.bfloat16)
        self.b2_pad = b2p

    def __call__(self, atom_types, scalar_feats, t_embed, *, max_row_tile=512):
        E = atom_types.shape[0]
        NS = self.num_scalar_features

        # Scalar features ++ sigma embedding, bf16 + lane padding in one concat.
        pad_cols = self.ns_pad - NS
        xs = jnp.concatenate(
            [scalar_feats.astype(jnp.bfloat16),
             t_embed.astype(jnp.bfloat16),
             jnp.zeros((E, pad_cols), jnp.bfloat16)],
            axis=-1,
        )
        idx = atom_types.astype(jnp.int32).reshape(E, 1)

        # Large row tiles amortize per-grid-step overhead; pad ragged E instead of
        # shrinking the tile.
        row_tile = min(max_row_tile, _round_up(E, 8))
        e_pad = _round_up(E, row_tile)
        if e_pad != E:
            xs = jnp.pad(xs, ((0, e_pad - E), (0, 0)))
            idx = jnp.pad(idx, ((0, e_pad - E), (0, 0)))

        out = atom_mlp_pallas(idx, xs, self.w1c_bf, self.w1s_bf, self.b1_pad,
                              self.w2_bf, self.b2_pad, row_tile=row_tile)
        return out[:E, :self.emb_dim]


# ----------------------------------------------------------------------------
# References for correctness checking
# ----------------------------------------------------------------------------
def _reference_bf16(enc, atom_types, scalar_feats, t_embed):
    """Matches the kernel's dtypes/padding exactly (tight tolerance check)."""
    E = atom_types.shape[0]
    onehot = jax.nn.one_hot(atom_types, enc.nc_pad, dtype=jnp.bfloat16)
    xs = jnp.concatenate(
        [scalar_feats.astype(jnp.bfloat16),
         t_embed.astype(jnp.bfloat16),
         jnp.zeros((E, enc.ns_pad - enc.num_scalar_features), jnp.bfloat16)],
        axis=-1,
    )
    h = jnp.dot(onehot, enc.w1c_bf, preferred_element_type=jnp.float32)
    h = h + jnp.dot(xs, enc.w1s_bf, preferred_element_type=jnp.float32)
    h = jnp.maximum(h + enc.b1_pad, 0.0)
    y = jnp.dot(h.astype(jnp.bfloat16), enc.w2_bf,
                preferred_element_type=jnp.float32) + enc.b2_pad
    return y[:, :enc.emb_dim]


def _reference_f32(enc, atom_types, scalar_feats, t_embed):
    """Full-f32 module semantics (loose tolerance check vs bf16 kernel)."""
    cat = jax.nn.one_hot(atom_types, enc.num_categorical_features, dtype=jnp.float32)
    x = jnp.concatenate([cat, scalar_feats, t_embed], axis=-1)
    h = jnp.maximum(x @ enc.w1 + enc.b1, 0.0)
    return h @ enc.w2 + enc.b2


if __name__ == "__main__":
    key = jax.random.PRNGKey(0)
    kp, ka, ks, kt = jax.random.split(key, 4)

    # Small shapes consistent with the module's forward:
    num_atoms = 16
    emb_dim = 32
    feature_dims = (5, 3)     # (num categorical atom types, num scalar feats)
    sigma_embed_dim = 8

    enc = AtomEncoder(emb_dim, feature_dims, sigma_embed_dim, kp)

    atom_types = jax.random.randint(ka, (num_atoms,), 0, feature_dims[0])
    scalar_feats = jax.random.normal(ks, (num_atoms, feature_dims[1]), jnp.float32)
    t_embed = jax.random.normal(kt, (num_atoms, sigma_embed_dim), jnp.float32)

    out = enc(atom_types, scalar_feats, t_embed)
    out = jax.block_until_ready(out)
    assert out.shape == (num_atoms, emb_dim)

    # Tight check: kernel vs dtype-matched reference.
    ref_bf = _reference_bf16(enc, atom_types, scalar_feats, t_embed)
    assert jnp.allclose(out, ref_bf, atol=2e-3, rtol=2e-3), "mismatch vs bf16 reference"

    # Loose check: bf16 kernel vs original f32 module semantics.
    ref_f32 = _reference_f32(enc, atom_types, scalar_feats, t_embed)
    assert jnp.allclose(out, ref_f32, atol=1e-1, rtol=1e-1), "mismatch vs f32 reference"

    print("KERNEL_OK")
</pallas_src>

<mosaic_0001>
module attributes {stable_mosaic.version = 11 : i64} {
  func.func @_atom_mlp_kernel(%arg0: i32, %arg1: memref<16x1xi32, #tpu.memory_space<vmem>>, %arg2: memref<16x16xbf16, #tpu.memory_space<vmem>>, %arg3: memref<16x128xbf16, #tpu.memory_space<vmem>>, %arg4: memref<16x128xbf16, #tpu.memory_space<vmem>>, %arg5: memref<1x128xf32, #tpu.memory_space<vmem>>, %arg6: memref<128x128xbf16, #tpu.memory_space<vmem>>, %arg7: memref<1x128xf32, #tpu.memory_space<vmem>>, %arg8: memref<16x128xf32, #tpu.memory_space<vmem>>) attributes {dimension_semantics = [#tpu.dimension_semantics<parallel>], iteration_bounds = array<i64: 1>, scalar_prefetch = 0 : i64, scratch_operands = 0 : i64, tpu.core_type = #tpu.core_type<tc>, window_params = [{transform_indices = @transform_0, window_bounds = array<i64: 16, 1>}, {transform_indices = @transform_1, window_bounds = array<i64: 16, 16>}, {pipeline_mode = #tpu.pipeline_mode<synchronous>, transform_indices = @transform_2, window_bounds = array<i64: 16, 128>}, {pipeline_mode = #tpu.pipeline_mode<synchronous>, transform_indices = @transform_3, window_bounds = array<i64: 16, 128>}, {pipeline_mode = #tpu.pipeline_mode<synchronous>, transform_indices = @transform_4, window_bounds = array<i64: 1, 128>}, {pipeline_mode = #tpu.pipeline_mode<synchronous>, transform_indices = @transform_5, window_bounds = array<i64: 128, 128>}, {pipeline_mode = #tpu.pipeline_mode<synchronous>, transform_indices = @transform_6, window_bounds = array<i64: 1, 128>}, {transform_indices = @transform_7, window_bounds = array<i64: 16, 128>}]} {
    %0 = tpu.iota {dimensions = array<i32: 1>} : vector<16x16xi32>
    %c0 = arith.constant 0 : index
    %c0_0 = arith.constant 0 : index
    %1 = vector.load %arg1[%c0, %c0_0] : memref<16x1xi32, #tpu.memory_space<vmem>>, vector<16x1xi32>
    %2 = vector.broadcast %1 : vector<16x1xi32> to vector<16x16xi32>
    %3 = arith.cmpi eq, %0, %2 : vector<16x16xi32>
    %4 = arith.extui %3 : vector<16x16xi1> to vector<16x16xi32>
    %5 = arith.sitofp %4 : vector<16x16xi32> to vector<16x16xf32>
    %6 = arith.truncf %5 : vector<16x16xf32> to vector<16x16xbf16>
    %c0_1 = arith.constant 0 : index
    %c0_2 = arith.constant 0 : index
    %7 = vector.load %arg3[%c0_1, %c0_2] : memref<16x128xbf16, #tpu.memory_space<vmem>>, vector<16x128xbf16>
    %cst = arith.constant dense<0.000000e+00> : vector<16x128xf32>
    %8 = tpu.matmul %6, %7, %cst {dimension_numbers = #tpu.dot_dimension_numbers<[1], [0], [0], [1], [0, 0, 1, 1], [], []>} : vector<16x16xbf16>, vector<16x128xbf16>, vector<16x128xf32> -> vector<16x128xf32>
    %c0_3 = arith.constant 0 : index
    %c0_4 = arith.constant 0 : index
    %9 = vector.load %arg2[%c0_3, %c0_4] : memref<16x16xbf16, #tpu.memory_space<vmem>>, vector<16x16xbf16>
    %c0_5 = arith.constant 0 : index
    %c0_6 = arith.constant 0 : index
    %10 = vector.load %arg4[%c0_5, %c0_6] : memref<16x128xbf16, #tpu.memory_space<vmem>>, vector<16x128xbf16>
    %cst_7 = arith.constant dense<0.000000e+00> : vector<16x128xf32>
    %11 = tpu.matmul %9, %10, %cst_7 {dimension_numbers = #tpu.dot_dimension_numbers<[1], [0], [0], [1], [0, 0, 1, 1], [], []>} : vector<16x16xbf16>, vector<16x128xbf16>, vector<16x128xf32> -> vector<16x128xf32>
    %12 = arith.addf %8, %11 : vector<16x128xf32>
    %c0_8 = arith.constant 0 : index
    %c0_9 = arith.constant 0 : index
    %13 = vector.load %arg5[%c0_8, %c0_9] : memref<1x128xf32, #tpu.memory_space<vmem>>, vector<1x128xf32>
    %14 = vector.broadcast %13 : vector<1x128xf32> to vector<16x128xf32>
    %15 = arith.addf %12, %14 : vector<16x128xf32>
    %cst_10 = arith.constant 0.000000e+00 : f32
    %16 = vector.broadcast %cst_10 : f32 to vector<16x128xf32>
    %17 = arith.maximumf %15, %16 : vector<16x128xf32>
    %18 = arith.truncf %17 : vector<16x128xf32> to vector<16x128xbf16>
    %c0_11 = arith.constant 0 : index
    %c0_12 = arith.constant 0 : index
    %19 = vector.load %arg6[%c0_11, %c0_12] : memref<128x128xbf16, #tpu.memory_space<vmem>>, vector<128x128xbf16>
    %cst_13 = arith.constant dense<0.000000e+00> : vector<16x128xf32>
    %20 = tpu.matmul %18, %19, %cst_13 {dimension_numbers = #tpu.dot_dimension_numbers<[1], [0], [0], [1], [0, 0, 1, 1], [], []>} : vector<16x128xbf16>, vector<128x128xbf16>, vector<16x128xf32> -> vector<16x128xf32>
    %c0_14 = arith.constant 0 : index
    %c0_15 = arith.constant 0 : index
    %21 = vector.load %arg7[%c0_14, %c0_15] : memref<1x128xf32, #tpu.memory_space<vmem>>, vector<1x128xf32>
    %22 = vector.broadcast %21 : vector<1x128xf32> to vector<16x128xf32>
    %23 = arith.addf %20, %22 : vector<16x128xf32>
    %c0_16 = arith.constant 0 : index
    %c0_17 = arith.constant 0 : index
    %24 = vector.load %arg8[%c0_16, %c0_17] : memref<16x128xf32, #tpu.memory_space<vmem>>, vector<16x128xf32>
    tpu.vector_store %arg8[%c0_16, %c0_17], %23 {strides = array<i32>} : memref<16x128xf32, #tpu.memory_space<vmem>>, vector<16x128xf32>,
    return
  }
  func.func @transform_0(%arg0: i32) -> (i32, i32) {
    %c0_i32 = arith.constant 0 : i32
    %c0_i32_0 = arith.constant 0 : i32
    return %arg0, %c0_i32 : i32, i32
  }
  func.func @transform_1(%arg0: i32) -> (i32, i32) {
    %c0_i32 = arith.constant 0 : i32
    %c0_i32_0 = arith.constant 0 : i32
    return %arg0, %c0_i32 : i32, i32
  }
  func.func @transform_2(%arg0: i32) -> (i32, i32) {
    %c0_i32 = arith.constant 0 : i32
    %c0_i32_0 = arith.constant 0 : i32
    %c0_i32_1 = arith.constant 0 : i32
    return %c0_i32, %c0_i32_0 : i32, i32
  }
  func.func @transform_3(%arg0: i32) -> (i32, i32) {
    %c0_i32 = arith.constant 0 : i32
    %c0_i32_0 = arith.constant 0 : i32
    %c0_i32_1 = arith.constant 0 : i32
    return %c0_i32, %c0_i32_0 : i32, i32
  }
  func.func @transform_4(%arg0: i32) -> (i32, i32) {
    %c0_i32 = arith.constant 0 : i32
    %c0_i32_0 = arith.constant 0 : i32
    %c0_i32_1 = arith.constant 0 : i32
    return %c0_i32, %c0_i32_0 : i32, i32
  }
  func.func @transform_5(%arg0: i32) -> (i32, i32) {
    %c0_i32 = arith.constant 0 : i32
    %c0_i32_0 = arith.constant 0 : i32
    %c0_i32_1 = arith.constant 0 : i32
    return %c0_i32, %c0_i32_0 : i32, i32
  }
  func.func @transform_6(%arg0: i32) -> (i32, i32) {
    %c0_i32 = arith.constant 0 : i32
    %c0_i32_0 = arith.constant 0 : i32
    %c0_i32_1 = arith.constant 0 : i32
    return %c0_i32, %c0_i32_0 : i32, i32
  }
  func.func @transform_7(%arg0: i32) -> (i32, i32) {
    %c0_i32 = arith.constant 0 : i32
    %c0_i32_0 = arith.constant 0 : i32
    return %arg0, %c0_i32 : i32, i32
  }
}

</mosaic_0001>

<bundles_post_ra>
// kernel: tpu_custom_call.1
= control target key start
LH: loop header
LB: loop body
LE: loop exit
PB: predicated region body
PF: predicated region fallthrough
CT: control target
= control target key end

     0   :  { %12 = vsyncpa [#allocation3], 0  ;;  %s544_s0 = inlined_call_operand.vmem [shape: s32[16,1], index: 0, kind: input, shape index: {}]   ;;  %s545_s1 = inlined_call_operand.vmem [shape: bf16[16,16], index: 1, kind: input, shape index: {}]   ;;  %s546_s2 = inlined_call_operand.vmem [shape: bf16[16,128], index: 2, kind: input, shape index: {}]   ;;  %s547_s3 = inlined_call_operand.vmem [shape: bf16[16,128], index: 3, kind: input, shape index: {}]   ;;  %s548_s4 = inlined_call_operand.vmem [shape: f32[1,128], index: 4, kind: input, shape index: {}]   ;;  %s549_s5 = inlined_call_operand.hbm [shape: bf16[128,128], index: 5, kind: input, shape index: {}]   ;;  %s550_s6 = inlined_call_operand.vmem [shape: f32[1,128], index: 6, kind: input, shape index: {}]   ;;  %s551_s7 = inlined_call_operand.hbm [shape: f32[16,128], index: 7, kind: output, shape index: {}]  }
   0x1   :  { %13 = vsyncpa [#allocation4], 0  ;;  %s445_s24 = smov [#allocation2]   ;;  %s397_s28 = scalar_lea.hbm %s549_s5, 1024 }
   0x2   :  { %s29_s25 = sshll.u32 %s445_s24, 4  ;;  %p398_p0 = scmp.ne.s32.totalorder %s549_s5, %s397_s28  ;;  %s30_s25 = int_to_ptr.vmem [resolvable:$true] %s29_s25 }
   0x3   :  { %p401_p1 = scmp.lt.u32.totalorder %s397_s28, %s549_s5 }
   0x5   :  { %p403_p2 = pnand %p401_p1, %p398_p0 }
   0x7   :  { %406 = shalt.err (!%p403_p2)
}
   0x8   :  { %s407_s10 = scalar_lea.vmem %s30_s25, 1024  ;;  %p412_p4 = scmp.lt.s32.totalorder %s30_s25, %s30_s25 }
   0x9   :  { %p408_p3 = scmp.ne.s32.totalorder %s30_s25, %s407_s10  ;;  %p413_p5 = scmp.lt.s32.totalorder %s407_s10, %s407_s10 }
   0xb   :  { %p414_p6 = por %p413_p5, %p412_p4 }
   0xd   :  { %p415_p7 = pnand %p414_p6, %p408_p3 }
   0xf   :  { %418 = shalt.err (!%p415_p7)
}
  0x10   :  { %s446_s11 = smov 64   ;;  %s447_s12 = smov 4  }
  0x11   :  { %35 = dma.hbm_to_vmem [thread:$0]  %s549_s5, 1024, %s30_s25, [#allocation3], %s446_s11, %s446_s11, %s447_s12  }
  0x12   :  { %441 = dma.done.wait [#allocation3], 1024  }
  0x13   :  { %442 = vsyncadd [#allocation3], 4294966272  ;;  %v448_v0 = vmov 0   ;;  %v449_v1 = vmov 0.0   ;;  %vm450_vm0 = vmmov 0   ;;  %v44_v2 = vld [vmem:[%s544_s0] sm:$0xff]  ;;  %v42_v12 = vlaneseq }
  0x14   :  { %385 = vset.pattern.permute.xlu0 %v448_v0  ;;  %344 = vmatprep.subr.bf16.mxu1 %v449_v1  ;;  %v45_v3 = vld [vmem:[%s544_s0 + $0x8] sm:$0xff]  ;;  %v386_v4 = vld [vmem:[%s547_s3] sm:$0xff]   ;;  %vm76_vm1 = vcmask 130048   ;;  %v389_v7 = vld [vmem:[#allocation2] sm:$0xff]   ;;  %s451_s24 = smov [#allocation5]  }
  0x15   :  { %346 = vmatprep.mubr.msk.bf16.mxu1 %vm450_vm0, %v449_v1  ;;  %356 = vmatprep.subr.bf16.mxu0 %v449_v1  ;;  %v387_v5 = vld [vmem:[%s545_s1] sm:$0xff]   ;;  %v391_v9 = vld [vmem:[#allocation2 + $0x10] sm:$0xff]   ;;  %v392_v10 = vld [vmem:[#allocation2 + $0x18] sm:$0xff]   ;;  %v43_v13 = vand.u32 127, %v42_v12  ;;  %s302_s25 = sshll.u32 %s451_s24, 4  ;;  %s303_s25 = int_to_ptr.vmem [resolvable:$true] %s302_s25 }
  0x16   :  { %372 = vmatprep.mubr.msk.bf16.mxu0 %vm450_vm0, %v449_v1  ;;  %47 = vperm.xlu0 %385, %v44_v2   ;;  %v388_v6 = vld [vmem:[%s546_s2] sm:$0xff]   ;;  %v393_v11 = vld [vmem:[#allocation2 + $0x20] sm:$0xff]   ;;  %v395_v24 = vld [vmem:[#allocation2 + $0x30] sm:$0xff]   ;;  %p424_p9 = scmp.lt.s32.totalorder %s303_s25, %s303_s25 }
  0x17   :  { %345 = vmatpush3.bf16.msra.mxu1 %v386_v4  ;;  %357 = vmatpush3.bf16.msra.mxu0 %v389_v7  ;;  %v390_v8 = vld [vmem:[#allocation2 + $0x8] sm:$0xff]   ;;  %v396_v25 = vld [vmem:[#allocation2 + $0x38] sm:$0xff]  }
  0x18   :  { %350 = vmatprep.subr.bf16.mxu1 %v449_v1  ;;  %358 = vmatprep.subr.bf16.mxu0 %v449_v1  ;;  %v394_v21 = vld [vmem:[#allocation2 + $0x28] sm:$0xff]  }
  0x19   :  { %v321_v27 = vld [vmem:[%s548_s4] ss:$0 sm:$0xff]  ;;  %s419_s4 = scalar_lea.vmem %s303_s25, 256 }
  0x1a   :  { %50 = vperm.xlu0 %385, %v45_v3   ;;  %347 = vmatmul.mubr.msk.bf16.vlgmr.msra.gmra.mrb[0].mxu1 %vm76_vm1, %v387_v5  ;;  %v322_v38 = vld [vmem:[%s550_s6] ss:$0 sm:$0xff]  ;;  %p420_p8 = scmp.ne.s32.totalorder %s303_s25, %s419_s4  ;;  %p425_p10 = scmp.lt.s32.totalorder %s419_s4, %s419_s4 }
  0x1b   :  { %351 = vmatpush3.bf16.msra.mxu1 %v388_v6  ;;  %352 = vmatprep.mubr.msk.bf16.mxu1 %vm450_vm0, %v449_v1 }
  0x1c   :  { %359 = vmatpush3.bf16.msra.mxu0 %v390_v8  ;;  %p426_p11 = por %p425_p10, %p424_p9 }
  0x1d   :  { %360 = vmatprep.subr.bf16.mxu0 %v449_v1 }
  0x1e   :  { %p427_p12 = pnand %p426_p11, %p420_p8 }
  0x20   :  { %361 = vmatpush3.bf16.msra.mxu0 %v391_v9 }
  0x21   :  { %362 = vmatprep.subr.bf16.mxu0 %v449_v1 }
  0x24   :  { %363 = vmatpush3.bf16.msra.mxu0 %v392_v10 }
  0x25   :  { %364 = vmatprep.subr.bf16.mxu0 %v449_v1 }
  0x28   :  { %365 = vmatpush3.bf16.msra.mxu0 %v393_v11 }
  0x29   :  { %366 = vmatprep.subr.bf16.mxu0 %v449_v1 }
  0x2c   :  { %367 = vmatpush3.bf16.msra.mxu0 %v394_v21 }
  0x2d   :  { %368 = vmatprep.subr.bf16.mxu0 %v449_v1 }
  0x30   :  { %369 = vmatpush3.bf16.msra.mxu0 %v395_v24 }
  0x31   :  { %370 = vmatprep.subr.bf16.mxu0 %v449_v1 }
  0x34   :  { %371 = vmatpush3.bf16.msra.mxu0 %v396_v25 }
  0x95   :  { %v48_v14 = vpop.permute.xlu0 %47 }
  0x96   :  { %vm52_vm2 = vcmp.eq.s32.totalorder %v43_v13, %v48_v14 }
  0x97   :  { %v314_v16 = vsel %vm52_vm2, 1.0, %v449_v1 }
  0x99   :  { %v51_v15 = vpop.permute.xlu0 %50 }
  0x9a   :  { %vm53_vm3 = vcmp.eq.s32.totalorder %v43_v13, %v51_v15 }
  0x9b   :  { %v315_v17 = vsel %vm53_vm3, 1.0, %v449_v1 }
  0x9c   :  { %v58_v18 = vpack.c.bf16 %v315_v17, %v314_v16 }
  0x9e   :  { %353 = vmatmul.mubr.msk.bf16.vlgmr.msra.gmra.mrb[4].mxu1 %vm76_vm1, %v58_v18 }
  0xed   :  { %v114_v19 = vpop.f32.mrb[0].mxu1 }
  0xee   :  { %v348_v20 = vpop.f32.mrb[1].mxu1 }
  0xef   :  { %v117_v22 = vpop.f32.mrb[2].mxu1 }
  0xf0   :  { %v349_v23 = vpop.f32.mrb[3].mxu1 }
 0x171   :  { %v164_v26 = vpop.f32.mrb[4].mxu1 }
 0x172   :  { %v165_v28 = vadd.f32 %v164_v26, %v114_v19  ;;  %v354_v29 = vpop.f32.mrb[5].mxu1 }
 0x173   :  { %v167_v30 = vpop.f32.mrb[6].mxu1 }
 0x174   :  { %v178_v31 = vadd.f32 %v321_v27, %v165_v28  ;;  %v168_v32 = vadd.f32 %v167_v30, %v117_v22  ;;  %v355_v33 = vpop.f32.mrb[7].mxu1 }
 0x176   :  { %v179_v34 = vadd.f32 %v321_v27, %v168_v32  ;;  %v180_v35 = vmax.f32 %v178_v31, 0.0 }
 0x178   :  { %v181_v36 = vmax.f32 %v179_v34, 0.0 }
 0x17a   :  { %v182_v37 = vpack.c.bf16 %v181_v36, %v180_v35 }
 0x17c   :  { %373 = vmatmul.mubr.bf16.vlgmr.msra.gmra.mrb[0].mxu0 %v182_v37 }
 0x24f   :  { %v288_v39 = vpop.f32.mrb[0].mxu0 }
 0x250   :  { %v289_v40 = vadd.f32 %v322_v38, %v288_v39  ;;  %v374_v41 = vpop.f32.mrb[1].mxu0 }
 0x251   :  { %v291_v42 = vpop.f32.mrb[2].mxu0 }
 0x252   :  { %295 = vst [vmem:[#allocation5] sm:$0xff] %v289_v40  ;;  %v292_v43 = vadd.f32 %v322_v38, %v291_v42  ;;  %v375_v44 = vpop.f32.mrb[3].mxu0 }
 0x254   :  { %296 = vst [vmem:[#allocation5 + $0x8] sm:$0xff] %v292_v43 }
 0x255   :  { %430 = shalt.err (!%p427_p12)
}
 0x256   :  { %s431_s27 = scalar_lea.hbm %s551_s7, 256 }
 0x257   :  { %p432_p13 = scmp.ne.s32.totalorder %s551_s7, %s431_s27  ;;  %p435_p0 = scmp.lt.u32.totalorder %s431_s27, %s551_s7 }
 0x259   :  { %p437_p1 = pnand %p435_p0, %p432_p13 }
 0x25b   :  { %440 = shalt.err (!%p437_p1)
}
 0x25c   :  { %s452_s9 = smov 128   ;;  %s453_s10 = smov 8  }
 0x25d   :  { %308 = dma.vmem_to_hbm [thread:$0]  %s303_s25, 256, %s551_s7, [#allocation4], %s452_s9, %s452_s9, %s453_s10  }
 0x25e   :  { %443 = dma.done.wait [#allocation4], 256  }
 0x25f   :  { %444 = vsyncadd [#allocation4], 4294967040 }
 0x260   :  { %312 = vsyncpa [#allocation3], 1 }
 0x261   :  { %313 = vsyncpa [#allocation4], 1 }

</bundles_post_ra>
